<compile_context>
chip_gen: v7x
topology: tpu7x:2x2x1
jax: 0.10.0
libtpu: 0.0.40
codegen_flags: <defaults>
</compile_context>

<pallas_src>
import functools

import jax
import jax.numpy as jnp
from jax.experimental import pallas as pl
from jax.experimental.pallas import tpu as pltpu


def _round_up(x, m):
    return (x + m - 1) // m * m


# ----------------------------------------------------------------------------
# Fused Pallas kernel: full GCN forward in one invocation.
#   refs = (a_ref, h_ref, W0, b0, W1, b1, ..., W_{L-1}, b_{L-1}, out_ref)
# ----------------------------------------------------------------------------
def _gcn_fused_kernel(*refs, num_layers):
    a_ref, h_ref = refs[0], refs[1]
    out_ref = refs[-1]

    a = a_ref[...]          # [Np, Np]   normalized adjacency, resident in VMEM
    h = h_ref[...]          # [Np, Fp_in]

    for li in range(num_layers):
        w = refs[2 + 2 * li][...]        # [Fp_in, Fp_out]
        b = refs[3 + 2 * li][...]        # [1,     Fp_out]
        f_in, f_out = w.shape

        # A @ (H @ W) == (A @ H) @ W.  Keep the expensive N x N aggregation
        # matmul at the *smaller* feature width.
        if f_out >= f_in:
            agg = jnp.dot(a, h, preferred_element_type=jnp.float32)
            h = jnp.dot(agg, w, preferred_element_type=jnp.float32) + b
        else:
            z = jnp.dot(h, w, preferred_element_type=jnp.float32)
            h = jnp.dot(a, z, preferred_element_type=jnp.float32) + b

        if li != num_layers - 1:         # hidden layers: ReLU; last: none
            h = jnp.maximum(h, 0.0)

    out_ref[...] = h.astype(out_ref.dtype)


def _full_block_spec(x):
    # Whole array as a single VMEM block (block shape == array shape satisfies
    # the (8,128) rule via the "full dims" exception; after padding all last
    # dims are 128-multiples anyway -> lane-dense, unmasked accesses).
    return pl.BlockSpec(x.shape, lambda i: (0,) * x.ndim)


def _gcn_pallas_forward(a_norm, features, params):
    """One fused pallas_call computing the whole multi-layer GCN forward."""
    num_nodes, in_feats = features.shape
    n_classes = params[-1][0].shape[1]
    num_layers = len(params)

    # ---- layout padding: node dim -> multiple of 8 (sublane), feature dims
    # ---- -> multiples of 128 (lane).  Zero padding is mathematically exact.
    n_pad = _round_up(num_nodes, 8)
    fin_pad = _round_up(in_feats, 128)
    cls_pad = _round_up(n_classes, 128)

    a_p = jnp.pad(a_norm, ((0, n_pad - num_nodes), (0, n_pad - num_nodes)))
    h_p = jnp.pad(features, ((0, n_pad - num_nodes), (0, fin_pad - in_feats)))

    flat_wb = []
    for W, b in params:
        fi, fo = W.shape
        fi_p, fo_p = _round_up(fi, 128), _round_up(fo, 128)
        flat_wb.append(jnp.pad(W, ((0, fi_p - fi), (0, fo_p - fo))))
        flat_wb.append(jnp.pad(b, ((0, 0), (0, fo_p - fo))))

    inputs = (a_p, h_p, *flat_wb)
    kernel = functools.partial(_gcn_fused_kernel, num_layers=num_layers)

    out_padded = pl.pallas_call(
        kernel,
        out_shape=jax.ShapeDtypeStruct((n_pad, cls_pad), jnp.float32),
        grid_spec=pltpu.PrefetchScalarGridSpec(
            num_scalar_prefetch=0,
            grid=(1,),
            in_specs=[_full_block_spec(x) for x in inputs],
            out_specs=pl.BlockSpec((n_pad, cls_pad), lambda i: (0, 0)),
        ),
        compiler_params=pltpu.CompilerParams(
            dimension_semantics=("arbitrary",),
        ),
    )(*inputs)

    return out_padded[:num_nodes, :n_classes]


# Jit the driver: a single XLA program / single dispatch for the whole forward
# (pads + fused kernel + final slice all live in one compiled program).
gcn_forward = jax.jit(_gcn_pallas_forward)


# ----------------------------------------------------------------------------
# Parameter / graph construction (deterministic, in-script)
# ----------------------------------------------------------------------------
def init_gcn_params(key, in_feats, n_hidden, n_classes, n_layers):
    """Glorot-style init for all GraphConv layers (weights + post-agg bias)."""
    dims = [in_feats] + [n_hidden] * n_layers + [n_classes]
    params = []
    for fin, fout in zip(dims[:-1], dims[1:]):
        key, kw = jax.random.split(key)
        scale = jnp.sqrt(6.0 / (fin + fout)).astype(jnp.float32)
        W = jax.random.uniform(kw, (fin, fout), jnp.float32, -scale, scale)
        b = jnp.zeros((1, fout), jnp.float32)
        params.append((W, b))
    return params


def build_normalized_adjacency(key, num_nodes, edge_prob=0.15):
    """Dense symmetric adjacency with self-loops, D^{-1/2}(A+I)D^{-1/2}."""
    adj = (jax.random.uniform(key, (num_nodes, num_nodes)) < edge_prob)
    adj = jnp.logical_or(adj, adj.T).astype(jnp.float32)
    adj = adj + jnp.eye(num_nodes, dtype=jnp.float32)          # self loops
    adj = jnp.minimum(adj, 1.0)
    deg = adj.sum(axis=1)
    d_inv_sqrt = 1.0 / jnp.sqrt(deg)
    return adj * d_inv_sqrt[:, None] * d_inv_sqrt[None, :]


if __name__ == "__main__":
    num_nodes = 64
    in_feats = 16
    n_hidden = 32
    n_classes = 8
    n_layers = 2  # -> GraphConv dims: 16->32, 32->32, 32->8

    key = jax.random.PRNGKey(0)
    k_graph, k_feat, k_param = jax.random.split(key, 3)

    a_norm = build_normalized_adjacency(k_graph, num_nodes)
    features = jax.random.normal(k_feat, (num_nodes, in_feats), jnp.float32)
    params = init_gcn_params(k_param, in_feats, n_hidden, n_classes, n_layers)

    out = gcn_forward(a_norm, features, params)
    out = jax.block_until_ready(out)
    assert out.shape == (num_nodes, n_classes), out.shape

    # Cross-check against a pure-JAX reference of the module's math:
    # h = act(A @ (h @ W) + b) per layer, last layer without activation.
    h_ref = features
    for li, (W, b) in enumerate(params):
        h_ref = a_norm @ (h_ref @ W) + b
        if li != len(params) - 1:
            h_ref = jnp.maximum(h_ref, 0.0)
    assert jnp.allclose(out, h_ref, atol=2e-4, rtol=2e-4), (
        float(jnp.max(jnp.abs(out - h_ref))))

    print("KERNEL_OK")
</pallas_src>

<mosaic_0001>
module attributes {stable_mosaic.version = 11 : i64} {
  func.func @_gcn_fused_kernel(%arg0: i32, %arg1: memref<64x64xf32, #tpu.memory_space<vmem>>, %arg2: memref<64x128xf32, #tpu.memory_space<vmem>>, %arg3: memref<128x128xf32, #tpu.memory_space<vmem>>, %arg4: memref<1x128xf32, #tpu.memory_space<vmem>>, %arg5: memref<128x128xf32, #tpu.memory_space<vmem>>, %arg6: memref<1x128xf32, #tpu.memory_space<vmem>>, %arg7: memref<128x128xf32, #tpu.memory_space<vmem>>, %arg8: memref<1x128xf32, #tpu.memory_space<vmem>>, %arg9: memref<64x128xf32, #tpu.memory_space<vmem>>) attributes {dimension_semantics = [#tpu.dimension_semantics<arbitrary>], iteration_bounds = array<i64: 1>, scalar_prefetch = 0 : i64, scratch_operands = 0 : i64, tpu.core_type = #tpu.core_type<tc>, window_params = [{pipeline_mode = #tpu.pipeline_mode<synchronous>, transform_indices = @transform_0, window_bounds = array<i64: 64, 64>}, {pipeline_mode = #tpu.pipeline_mode<synchronous>, transform_indices = @transform_1, window_bounds = array<i64: 64, 128>}, {pipeline_mode = #tpu.pipeline_mode<synchronous>, transform_indices = @transform_2, window_bounds = array<i64: 128, 128>}, {pipeline_mode = #tpu.pipeline_mode<synchronous>, transform_indices = @transform_3, window_bounds = array<i64: 1, 128>}, {pipeline_mode = #tpu.pipeline_mode<synchronous>, transform_indices = @transform_4, window_bounds = array<i64: 128, 128>}, {pipeline_mode = #tpu.pipeline_mode<synchronous>, transform_indices = @transform_5, window_bounds = array<i64: 1, 128>}, {pipeline_mode = #tpu.pipeline_mode<synchronous>, transform_indices = @transform_6, window_bounds = array<i64: 128, 128>}, {pipeline_mode = #tpu.pipeline_mode<synchronous>, transform_indices = @transform_7, window_bounds = array<i64: 1, 128>}, {pipeline_mode = #tpu.pipeline_mode<synchronous>, transform_indices = @transform_8, window_bounds = array<i64: 64, 128>}]} {
    %c0 = arith.constant 0 : index
    %c0_0 = arith.constant 0 : index
    %0 = vector.load %arg1[%c0, %c0_0] : memref<64x64xf32, #tpu.memory_space<vmem>>, vector<64x64xf32>
    %c0_1 = arith.constant 0 : index
    %c0_2 = arith.constant 0 : index
    %1 = vector.load %arg2[%c0_1, %c0_2] : memref<64x128xf32, #tpu.memory_space<vmem>>, vector<64x128xf32>
    %c0_3 = arith.constant 0 : index
    %c0_4 = arith.constant 0 : index
    %2 = vector.load %arg3[%c0_3, %c0_4] : memref<128x128xf32, #tpu.memory_space<vmem>>, vector<128x128xf32>
    %c0_5 = arith.constant 0 : index
    %c0_6 = arith.constant 0 : index
    %3 = vector.load %arg4[%c0_5, %c0_6] : memref<1x128xf32, #tpu.memory_space<vmem>>, vector<1x128xf32>
    %cst = arith.constant dense<0.000000e+00> : vector<64x128xf32>
    %4 = tpu.matmul %0, %1, %cst {dimension_numbers = #tpu.dot_dimension_numbers<[1], [0], [0], [1], [0, 0, 1, 1], [], []>} : vector<64x64xf32>, vector<64x128xf32>, vector<64x128xf32> -> vector<64x128xf32>
    %cst_7 = arith.constant dense<0.000000e+00> : vector<64x128xf32>
    %5 = tpu.matmul %4, %2, %cst_7 {dimension_numbers = #tpu.dot_dimension_numbers<[1], [0], [0], [1], [0, 0, 1, 1], [], []>} : vector<64x128xf32>, vector<128x128xf32>, vector<64x128xf32> -> vector<64x128xf32>
    %6 = vector.broadcast %3 : vector<1x128xf32> to vector<64x128xf32>
    %7 = arith.addf %5, %6 : vector<64x128xf32>
    %cst_8 = arith.constant 0.000000e+00 : f32
    %8 = vector.broadcast %cst_8 : f32 to vector<64x128xf32>
    %9 = arith.maximumf %7, %8 : vector<64x128xf32>
    %c0_9 = arith.constant 0 : index
    %c0_10 = arith.constant 0 : index
    %10 = vector.load %arg5[%c0_9, %c0_10] : memref<128x128xf32, #tpu.memory_space<vmem>>, vector<128x128xf32>
    %c0_11 = arith.constant 0 : index
    %c0_12 = arith.constant 0 : index
    %11 = vector.load %arg6[%c0_11, %c0_12] : memref<1x128xf32, #tpu.memory_space<vmem>>, vector<1x128xf32>
    %cst_13 = arith.constant dense<0.000000e+00> : vector<64x128xf32>
    %12 = tpu.matmul %0, %9, %cst_13 {dimension_numbers = #tpu.dot_dimension_numbers<[1], [0], [0], [1], [0, 0, 1, 1], [], []>} : vector<64x64xf32>, vector<64x128xf32>, vector<64x128xf32> -> vector<64x128xf32>
    %cst_14 = arith.constant dense<0.000000e+00> : vector<64x128xf32>
    %13 = tpu.matmul %12, %10, %cst_14 {dimension_numbers = #tpu.dot_dimension_numbers<[1], [0], [0], [1], [0, 0, 1, 1], [], []>} : vector<64x128xf32>, vector<128x128xf32>, vector<64x128xf32> -> vector<64x128xf32>
    %14 = vector.broadcast %11 : vector<1x128xf32> to vector<64x128xf32>
    %15 = arith.addf %13, %14 : vector<64x128xf32>
    %cst_15 = arith.constant 0.000000e+00 : f32
    %16 = vector.broadcast %cst_15 : f32 to vector<64x128xf32>
    %17 = arith.maximumf %15, %16 : vector<64x128xf32>
    %c0_16 = arith.constant 0 : index
    %c0_17 = arith.constant 0 : index
    %18 = vector.load %arg7[%c0_16, %c0_17] : memref<128x128xf32, #tpu.memory_space<vmem>>, vector<128x128xf32>
    %c0_18 = arith.constant 0 : index
    %c0_19 = arith.constant 0 : index
    %19 = vector.load %arg8[%c0_18, %c0_19] : memref<1x128xf32, #tpu.memory_space<vmem>>, vector<1x128xf32>
    %cst_20 = arith.constant dense<0.000000e+00> : vector<64x128xf32>
    %20 = tpu.matmul %0, %17, %cst_20 {dimension_numbers = #tpu.dot_dimension_numbers<[1], [0], [0], [1], [0, 0, 1, 1], [], []>} : vector<64x64xf32>, vector<64x128xf32>, vector<64x128xf32> -> vector<64x128xf32>
    %cst_21 = arith.constant dense<0.000000e+00> : vector<64x128xf32>
    %21 = tpu.matmul %20, %18, %cst_21 {dimension_numbers = #tpu.dot_dimension_numbers<[1], [0], [0], [1], [0, 0, 1, 1], [], []>} : vector<64x128xf32>, vector<128x128xf32>, vector<64x128xf32> -> vector<64x128xf32>
    %22 = vector.broadcast %19 : vector<1x128xf32> to vector<64x128xf32>
    %23 = arith.addf %21, %22 : vector<64x128xf32>
    %c0_22 = arith.constant 0 : index
    %c0_23 = arith.constant 0 : index
    %24 = vector.load %arg9[%c0_22, %c0_23] : memref<64x128xf32, #tpu.memory_space<vmem>>, vector<64x128xf32>
    tpu.vector_store %arg9[%c0_22, %c0_23], %23 {strides = array<i32>} : memref<64x128xf32, #tpu.memory_space<vmem>>, vector<64x128xf32>,
    return
  }
  func.func @transform_0(%arg0: i32) -> (i32, i32) {
    %c0_i32 = arith.constant 0 : i32
    %c0_i32_0 = arith.constant 0 : i32
    %c0_i32_1 = arith.constant 0 : i32
    return %c0_i32, %c0_i32_0 : i32, i32
  }
  func.func @transform_1(%arg0: i32) -> (i32, i32) {
    %c0_i32 = arith.constant 0 : i32
    %c0_i32_0 = arith.constant 0 : i32
    %c0_i32_1 = arith.constant 0 : i32
    return %c0_i32, %c0_i32_0 : i32, i32
  }
  func.func @transform_2(%arg0: i32) -> (i32, i32) {
    %c0_i32 = arith.constant 0 : i32
    %c0_i32_0 = arith.constant 0 : i32
    %c0_i32_1 = arith.constant 0 : i32
    return %c0_i32, %c0_i32_0 : i32, i32
  }
  func.func @transform_3(%arg0: i32) -> (i32, i32) {
    %c0_i32 = arith.constant 0 : i32
    %c0_i32_0 = arith.constant 0 : i32
    %c0_i32_1 = arith.constant 0 : i32
    return %c0_i32, %c0_i32_0 : i32, i32
  }
  func.func @transform_4(%arg0: i32) -> (i32, i32) {
    %c0_i32 = arith.constant 0 : i32
    %c0_i32_0 = arith.constant 0 : i32
    %c0_i32_1 = arith.constant 0 : i32
    return %c0_i32, %c0_i32_0 : i32, i32
  }
  func.func @transform_5(%arg0: i32) -> (i32, i32) {
    %c0_i32 = arith.constant 0 : i32
    %c0_i32_0 = arith.constant 0 : i32
    %c0_i32_1 = arith.constant 0 : i32
    return %c0_i32, %c0_i32_0 : i32, i32
  }
  func.func @transform_6(%arg0: i32) -> (i32, i32) {
    %c0_i32 = arith.constant 0 : i32
    %c0_i32_0 = arith.constant 0 : i32
    %c0_i32_1 = arith.constant 0 : i32
    return %c0_i32, %c0_i32_0 : i32, i32
  }
  func.func @transform_7(%arg0: i32) -> (i32, i32) {
    %c0_i32 = arith.constant 0 : i32
    %c0_i32_0 = arith.constant 0 : i32
    %c0_i32_1 = arith.constant 0 : i32
    return %c0_i32, %c0_i32_0 : i32, i32
  }
  func.func @transform_8(%arg0: i32) -> (i32, i32) {
    %c0_i32 = arith.constant 0 : i32
    %c0_i32_0 = arith.constant 0 : i32
    %c0_i32_1 = arith.constant 0 : i32
    return %c0_i32, %c0_i32_0 : i32, i32
  }
}

</mosaic_0001>

<bundles_post_ra>
// kernel: _gcn_pallas_forward.1
= control target key start
LH: loop header
LB: loop body
LE: loop exit
PB: predicated region body
PF: predicated region fallthrough
CT: control target
= control target key end

     0   :  { %vm62_vm0 = vcmask 523264   ;;  %s1638_s1 = inlined_call_operand.vmem [shape: f32[64,128], index: 1, kind: input, shape index: {}]   ;;  %s1639_s0 = inlined_call_operand.vmem [shape: f32[64,64], index: 0, kind: input, shape index: {}]   ;;  %s1640_s2 = inlined_call_operand.vmem [shape: f32[128,128], index: 2, kind: input, shape index: {}]   ;;  %s1641_s3 = inlined_call_operand.vmem [shape: f32[1,128], index: 3, kind: input, shape index: {}]   ;;  %s1642_s4 = inlined_call_operand.vmem [shape: f32[128,128], index: 4, kind: input, shape index: {}]   ;;  %s1643_s5 = inlined_call_operand.vmem [shape: f32[1,128], index: 5, kind: input, shape index: {}]   ;;  %s1644_s6 = inlined_call_operand.vmem [shape: f32[128,128], index: 6, kind: input, shape index: {}]   ;;  %s1645_s7 = inlined_call_operand.vmem [shape: f32[1,128], index: 7, kind: input, shape index: {}]   ;;  %s1646_s8 = inlined_call_operand.vmem [shape: f32[64,128], index: 8, kind: output, shape index: {}]  }
   0x1   :  { %v37_v0 = vld [vmem:[%s1638_s1] sm:$0xff]  ;;  %v38_v1 = vld [vmem:[%s1638_s1 + $0x8] sm:$0xff]  ;;  %v39_v2 = vld [vmem:[%s1638_s1 + $0x10] sm:$0xff] }
   0x2   :  { %v1160_v3 = vpack.c.bf16 %v38_v1, %v37_v0  ;;  %v40_v4 = vld [vmem:[%s1638_s1 + $0x18] sm:$0xff]  ;;  %v41_v6 = vld [vmem:[%s1638_s1 + $0x20] sm:$0xff]  ;;  %v42_v7 = vld [vmem:[%s1638_s1 + $0x28] sm:$0xff] }
   0x3   :  { %v1164_v5 = vpack.c.bf16 %v40_v4, %v39_v2  ;;  %v1370_v8 = vld [vmem:[%s1639_s0] sm:$0xff]  ;;  %v1168_v9 = vpack.c.bf16 %v42_v7, %v41_v6  ;;  %v43_v10 = vld [vmem:[%s1638_s1 + $0x30] sm:$0xff]  ;;  %v46_v12 = vld [vmem:[%s1640_s2 + $0x8] sm:$0xff] }
   0x4   :  { %1161 = vmatprep.subr.bf16.mxu0 %v1160_v3  ;;  %960 = vmatprep.mubr.msk.f32.mxu0 %vm62_vm0, %v1370_v8  ;;  %v45_v11 = vld [vmem:[%s1640_s2] sm:$0xff]  ;;  %v44_v13 = vld [vmem:[%s1638_s1 + $0x38] sm:$0xff]  ;;  %v47_v15 = vld [vmem:[%s1640_s2 + $0x10] sm:$0xff] }
   0x5   :  { %1163 = vmatpush3.bf16.msra.mxu0 %v1160_v3  ;;  %v1176_v14 = vpack.c.bf16 %v46_v12, %v45_v11  ;;  %v48_v16 = vld [vmem:[%s1640_s2 + $0x18] sm:$0xff]  ;;  %v49_v18 = vld [vmem:[%s1640_s2 + $0x20] sm:$0xff]  ;;  %v50_v19 = vld [vmem:[%s1640_s2 + $0x28] sm:$0xff]  ;;  %v1172_v20 = vpack.c.bf16 %v44_v13, %v43_v10 }
   0x6   :  { %1165 = vmatprep.subr.bf16.mxu0 %v1164_v5  ;;  %v1180_v17 = vpack.c.bf16 %v48_v16, %v47_v15  ;;  %v1184_v21 = vpack.c.bf16 %v50_v19, %v49_v18  ;;  %v51_v22 = vld [vmem:[%s1640_s2 + $0x30] sm:$0xff]  ;;  %v52_v23 = vld [vmem:[%s1640_s2 + $0x38] sm:$0xff]  ;;  %v53_v25 = vld [vmem:[%s1640_s2 + $0x40] sm:$0xff] }
   0x7   :  { %1177 = vmatprep.subr.bf16.mxu1 %v1176_v14  ;;  %v1188_v24 = vpack.c.bf16 %v52_v23, %v51_v22  ;;  %v54_v26 = vld [vmem:[%s1640_s2 + $0x48] sm:$0xff]  ;;  %v1418_v28 = vld [vmem:[%s1639_s0 + $0x10] sm:$0xff]  ;;  %v56_v31 = vld [vmem:[%s1640_s2 + $0x58] sm:$0xff] }
   0x8   :  { %1179 = vmatpush3.bf16.msra.mxu1 %v1176_v14  ;;  %v1413_v27 = vld [vmem:[%s1639_s0 + $0x8] sm:$0xff]  ;;  %v1192_v29 = vpack.c.bf16 %v54_v26, %v53_v25  ;;  %v55_v30 = vld [vmem:[%s1640_s2 + $0x50] sm:$0xff]  ;;  %v1433_v32 = vld [vmem:[%s1639_s0 + $0x18] sm:$0xff] }
   0x9   :  { %1167 = vmatpush3.bf16.msra.mxu0 %v1164_v5  ;;  %1181 = vmatprep.subr.bf16.mxu1 %v1180_v17  ;;  %v1438_v33 = vld [vmem:[%s1639_s0 + $0x20] sm:$0xff]  ;;  %v1196_v34 = vpack.c.bf16 %v56_v31, %v55_v30  ;;  %v58_v36 = vld [vmem:[%s1640_s2 + $0x68] sm:$0xff]  ;;  %v1458_v38 = vld [vmem:[%s1639_s0 + $0x30] sm:$0xff] }
   0xa   :  { %1169 = vmatprep.subr.bf16.mxu0 %v1168_v9  ;;  %v57_v35 = vld [vmem:[%s1640_s2 + $0x60] sm:$0xff]  ;;  %v1453_v37 = vld [vmem:[%s1639_s0 + $0x28] sm:$0xff]  ;;  %v59_v40 = vld [vmem:[%s1640_s2 + $0x70] sm:$0xff] }
   0xb   :  { %v1200_v39 = vpack.c.bf16 %v58_v36, %v57_v35  ;;  %v60_v41 = vld [vmem:[%s1640_s2 + $0x78] sm:$0xff]  ;;  %v805_v52 = vld [vmem:[%s1641_s3] ss:$0 sm:$0xff]  ;;  %v312_v16 = vld [vmem:[%s1642_s4 + $0x8] sm:$0xff] }
   0xc   :  { %1183 = vmatpush3.bf16.msra.mxu1 %v1180_v17  ;;  %v1473_v42 = vld [vmem:[%s1639_s0 + $0x38] sm:$0xff]  ;;  %v1204_v43 = vpack.c.bf16 %v60_v41, %v59_v40  ;;  %v311_v15 = vld [vmem:[%s1642_s4] sm:$0xff]  ;;  %v317_v26 = vld [vmem:[%s1642_s4 + $0x30] sm:$0xff] }
   0xd   :  { %1171 = vmatpush3.bf16.msra.mxu0 %v1168_v9  ;;  %1185 = vmatprep.subr.bf16.mxu1 %v1184_v21  ;;  %v1224_v19 = vpack.c.bf16 %v312_v16, %v311_v15  ;;  %v315_v23 = vld [vmem:[%s1642_s4 + $0x20] sm:$0xff]  ;;  %v321_v36 = vld [vmem:[%s1642_s4 + $0x50] sm:$0xff] }
   0xe   :  { %1173 = vmatprep.subr.bf16.mxu0 %v1172_v20  ;;  %v319_v31 = vld [vmem:[%s1642_s4 + $0x40] sm:$0xff] }
   0xf   :  { %v323_v41 = vld [vmem:[%s1642_s4 + $0x60] sm:$0xff] }
  0x10   :  { %1187 = vmatpush3.bf16.msra.mxu1 %v1184_v21  ;;  %v314_v21 = vld [vmem:[%s1642_s4 + $0x18] sm:$0xff] }
  0x11   :  { %1175 = vmatpush3.bf16.msra.mxu0 %v1172_v20  ;;  %1189 = vmatprep.subr.bf16.mxu1 %v1188_v24  ;;  %v313_v20 = vld [vmem:[%s1642_s4 + $0x10] sm:$0xff] }
  0x12   :  { %v1228_v22 = vpack.c.bf16 %v314_v21, %v313_v20  ;;  %v553_v20 = vld [vmem:[%s1644_s6 + $0x8] sm:$0xff] }
  0x14   :  { %961 = vmatmul.mubr.msk.f32.vlgmr.msra.gmra.mrb[0].mxu0 %vm62_vm0, %v1413_v27  ;;  %1191 = vmatpush3.bf16.msra.mxu1 %v1188_v24  ;;  %v316_v24 = vld [vmem:[%s1642_s4 + $0x28] sm:$0xff] }
  0x15   :  { %963 = vmatprep.mubr.msk.f32.mxu0 %vm62_vm0, %v1418_v28  ;;  %1193 = vmatprep.subr.bf16.mxu1 %v1192_v29  ;;  %v1232_v25 = vpack.c.bf16 %v316_v24, %v315_v23  ;;  %v554_v24 = vld [vmem:[%s1644_s6 + $0x10] sm:$0xff] }
  0x18   :  { %964 = vmatmul.mubr.msk.f32.gmra.mrb[2].mxu0 %vm62_vm0, %v1433_v32  ;;  %1195 = vmatpush3.bf16.msra.mxu1 %v1192_v29  ;;  %v318_v29 = vld [vmem:[%s1642_s4 + $0x38] sm:$0xff] }
  0x19   :  { %966 = vmatprep.mubr.msk.f32.mxu0 %vm62_vm0, %v1438_v33  ;;  %1197 = vmatprep.subr.bf16.mxu1 %v1196_v34  ;;  %v1236_v30 = vpack.c.bf16 %v318_v29, %v317_v26  ;;  %v556_v29 = vld [vmem:[%s1644_s6 + $0x20] sm:$0xff] }
  0x1c   :  { %967 = vmatmul.mubr.msk.f32.gmra.mrb[4].mxu0 %vm62_vm0, %v1453_v37  ;;  %1199 = vmatpush3.bf16.msra.mxu1 %v1196_v34  ;;  %v320_v34 = vld [vmem:[%s1642_s4 + $0x48] sm:$0xff] }
  0x1d   :  { %969 = vmatprep.mubr.msk.f32.mxu0 %vm62_vm0, %v1458_v38  ;;  %1201 = vmatprep.subr.bf16.mxu1 %v1200_v39  ;;  %v1240_v35 = vpack.c.bf16 %v320_v34, %v319_v31  ;;  %v558_v34 = vld [vmem:[%s1644_s6 + $0x30] sm:$0xff] }
  0x20   :  { %970 = vmatmul.mubr.msk.f32.gmra.mrb[6].mxu0 %vm62_vm0, %v1473_v42  ;;  %1203 = vmatpush3.bf16.msra.mxu1 %v1200_v39  ;;  %v322_v39 = vld [vmem:[%s1642_s4 + $0x58] sm:$0xff] }
  0x21   :  { %1032 = vmatprep.mubr.msk.f32.mxu0 %vm62_vm0, %v1370_v8  ;;  %1205 = vmatprep.subr.bf16.mxu1 %v1204_v43  ;;  %v1244_v40 = vpack.c.bf16 %v322_v39, %v321_v36  ;;  %v561_v36 = vld [vmem:[%s1644_s6 + $0x48] sm:$0xff]  ;;  %v563_v39 = vld [vmem:[%s1644_s6 + $0x58] sm:$0xff] }
  0x24   :  { %1207 = vmatpush3.bf16.msra.mxu1 %v1204_v43  ;;  %v324_v43 = vld [vmem:[%s1642_s4 + $0x68] sm:$0xff] }
  0xe7   :  { %v962_v44 = vpop.f32.mrb[0].mxu0 }
  0xe8   :  { %v153_v45 = vpop.f32.mrb[1].mxu0 }
  0xe9   :  { %1004 = vmatprep.mubr.f32.mxu1 %v153_v45  ;;  %v325_v45 = vld [vmem:[%s1642_s4 + $0x70] sm:$0xff] }
  0xea   :  { %1005 = vmatmul.mubr.f32.vlgmr.msra.gmra.mrb[0].mxu1 %v962_v44  ;;  %v1248_v44 = vpack.c.bf16 %v324_v43, %v323_v41  ;;  %v566_v43 = vld [vmem:[%s1644_s6 + $0x70] sm:$0xff] }
  0xeb   :  { %v965_v46 = vpop.f32.mrb[2].mxu0 }
  0xec   :  { %v163_v47 = vpop.f32.mrb[3].mxu0 }
  0xed   :  { %1007 = vmatprep.mubr.f32.mxu1 %v163_v47 }
  0xee   :  { %1008 = vmatmul.mubr.f32.gmra.mrb[2].mxu1 %v965_v46  ;;  %v326_v46 = vld [vmem:[%s1642_s4 + $0x78] sm:$0xff] }
  0xef   :  { %v968_v48 = vpop.f32.mrb[4].mxu0  ;;  %v1252_v47 = vpack.c.bf16 %v326_v46, %v325_v45 }
  0xf0   :  { %v173_v49 = vpop.f32.mrb[5].mxu0 }
  0xf1   :  { %1010 = vmatprep.mubr.f32.mxu1 %v173_v49 }
  0xf2   :  { %1011 = vmatmul.mubr.f32.gmra.mrb[4].mxu1 %v968_v48 }
  0xf3   :  { %v971_v50 = vpop.f32.mrb[6].mxu0 }
  0xf4   :  { %v183_v51 = vpop.f32.mrb[7].mxu0 }
  0xf5   :  { %1013 = vmatprep.mubr.f32.mxu1 %v183_v51 }
  0xf6   :  { %1014 = vmatmul.mubr.f32.gmra.mrb[6].mxu1 %v971_v50 }
  0xf7   :  { %1104 = vmatprep.mubr.msk.f32.mxu1 %vm62_vm0, %v1370_v8 }
 0x1bd   :  { %v1006_v53 = vpop.f32.mrb[0].mxu1 }
 0x1be   :  { %v270_v54 = vadd.f32 %v1006_v53, %v805_v52  ;;  %v264_v55 = vpop.f32.mrb[1].mxu1 }
 0x1bf   :  { %v265_v56 = vadd.f32 %v805_v52, %v264_v55 }
 0x1c0   :  { %v304_v57 = vmax.f32 %v270_v54, 0.0 }
 0x1c1   :  { %v303_v58 = vmax.f32 %v265_v56, 0.0  ;;  %v1009_v59 = vpop.f32.mrb[2].mxu1  ;;  %v814_v56 = vld [vmem:[%s1643_s5] ss:$0 sm:$0xff] }
 0x1c2   :  { %v280_v60 = vadd.f32 %v1009_v59, %v805_v52  ;;  %v274_v61 = vpop.f32.mrb[3].mxu1 }
 0x1c3   :  { %v1208_v62 = vpack.c.bf16 %v304_v57, %v303_v58  ;;  %v275_v63 = vadd.f32 %v805_v52, %v274_v61 }
 0x1c4   :  { %v306_v0 = vmax.f32 %v280_v60, 0.0 }
 0x1c5   :  { %v305_v1 = vmax.f32 %v275_v63, 0.0  ;;  %v1012_v2 = vpop.f32.mrb[4].mxu1  ;;  %1209 = vmatprep.subr.bf16.mxu0 %v1208_v62 }
 0x1c6   :  { %v290_v3 = vadd.f32 %v1012_v2, %v805_v52  ;;  %v284_v4 = vpop.f32.mrb[5].mxu1  ;;  %1211 = vmatpush3.bf16.msra.mxu0 %v1208_v62 }
 0x1c7   :  { %v1212_v5 = vpack.c.bf16 %v306_v0, %v305_v1  ;;  %v285_v6 = vadd.f32 %v805_v52, %v284_v4 }
 0x1c8   :  { %v308_v7 = vmax.f32 %v290_v3, 0.0 }
 0x1c9   :  { %v307_v8 = vmax.f32 %v285_v6, 0.0  ;;  %v1015_v9 = vpop.f32.mrb[6].mxu1  ;;  %1213 = vmatprep.subr.bf16.mxu0 %v1212_v5 }
 0x1ca   :  { %v300_v10 = vadd.f32 %v1015_v9, %v805_v52  ;;  %v294_v11 = vpop.f32.mrb[7].mxu1  ;;  %1215 = vmatpush3.bf16.msra.mxu0 %v1212_v5 }
 0x1cb   :  { %v1216_v12 = vpack.c.bf16 %v308_v7, %v307_v8  ;;  %v295_v13 = vadd.f32 %v805_v52, %v294_v11 }
 0x1cc   :  { %v310_v14 = vmax.f32 %v300_v10, 0.0 }
 0x1cd   :  { %v309_v17 = vmax.f32 %v295_v13, 0.0  ;;  %1217 = vmatprep.subr.bf16.mxu0 %v1216_v12 }
 0x1ce   :  { %1219 = vmatpush3.bf16.msra.mxu0 %v1216_v12 }
 0x1cf   :  { %v1220_v18 = vpack.c.bf16 %v310_v14, %v309_v17 }
 0x1d1   :  { %1221 = vmatprep.subr.bf16.mxu0 %v1220_v18 }
 0x1d2   :  { %1223 = vmatpush3.bf16.msra.mxu0 %v1220_v18 }
 0x1d3   :  { %1225 = vmatprep.subr.bf16.mxu0 %v1224_v19 }
 0x1d5   :  { %1033 = vmatmul.mubr.msk.f32.vlgmr.msra.gmra.mrb[8].mxu0 %vm62_vm0, %v1413_v27 }
 0x1d6   :  { %1035 = vmatprep.mubr.msk.f32.mxu0 %vm62_vm0, %v1418_v28  ;;  %1227 = vmatpush3.bf16.msra.mxu0 %v1224_v19  ;;  %v552_v19 = vld [vmem:[%s1644_s6] sm:$0xff] }
 0x1d7   :  { %1229 = vmatprep.subr.bf16.mxu0 %v1228_v22  ;;  %v1272_v23 = vpack.c.bf16 %v553_v20, %v552_v19 }
 0x1d9   :  { %1036 = vmatmul.mubr.msk.f32.gmra.mrb[10].mxu0 %vm62_vm0, %v1433_v32 }
 0x1da   :  { %1038 = vmatprep.mubr.msk.f32.mxu0 %vm62_vm0, %v1438_v33  ;;  %1231 = vmatpush3.bf16.msra.mxu0 %v1228_v22 }
 0x1db   :  { %1233 = vmatprep.subr.bf16.mxu0 %v1232_v25 }
 0x1dd   :  { %1039 = vmatmul.mubr.msk.f32.gmra.mrb[12].mxu0 %vm62_vm0, %v1453_v37 }
 0x1de   :  { %1041 = vmatprep.mubr.msk.f32.mxu0 %vm62_vm0, %v1458_v38  ;;  %1235 = vmatpush3.bf16.msra.mxu0 %v1232_v25  ;;  %v555_v25 = vld [vmem:[%s1644_s6 + $0x18] sm:$0xff] }
 0x1df   :  { %1237 = vmatprep.subr.bf16.mxu0 %v1236_v30  ;;  %v1276_v26 = vpack.c.bf16 %v555_v25, %v554_v24 }
 0x1e1   :  { %1042 = vmatmul.mubr.msk.f32.gmra.mrb[14].mxu0 %vm62_vm0, %v1473_v42 }
 0x1e2   :  { %1239 = vmatpush3.bf16.msra.mxu0 %v1236_v30  ;;  %v557_v30 = vld [vmem:[%s1644_s6 + $0x28] sm:$0xff] }
 0x1e3   :  { %1241 = vmatprep.subr.bf16.mxu0 %v1240_v35  ;;  %v1280_v31 = vpack.c.bf16 %v557_v30, %v556_v29 }
 0x1e6   :  { %1243 = vmatpush3.bf16.msra.mxu0 %v1240_v35  ;;  %v559_v35 = vld [vmem:[%s1644_s6 + $0x38] sm:$0xff] }
 0x1e7   :  { %1245 = vmatprep.subr.bf16.mxu0 %v1244_v40 }
 0x1ea   :  { %1247 = vmatpush3.bf16.msra.mxu0 %v1244_v40  ;;  %v565_v40 = vld [vmem:[%s1644_s6 + $0x68] sm:$0xff] }
 0x1eb   :  { %1249 = vmatprep.subr.bf16.mxu0 %v1248_v44 }
 0x1ee   :  { %1251 = vmatpush3.bf16.msra.mxu0 %v1248_v44 }
 0x1ef   :  { %1253 = vmatprep.subr.bf16.mxu0 %v1252_v47 }
 0x1f2   :  { %1255 = vmatpush3.bf16.msra.mxu0 %v1252_v47 }
 0x2a8   :  { %v1034_v48 = vpop.f32.mrb[8].mxu0 }
 0x2a9   :  { %v394_v49 = vpop.f32.mrb[9].mxu0 }
 0x2aa   :  { %1076 = vmatprep.mubr.f32.mxu0 %v394_v49 }
 0x2ab   :  { %1077 = vmatmul.mubr.f32.vlgmr.msra.gmra.mrb[16].mxu0 %v1034_v48 }
 0x2ac   :  { %v1037_v50 = vpop.f32.mrb[10].mxu0 }
 0x2ad   :  { %v404_v51 = vpop.f32.mrb[11].mxu0 }
 0x2ae   :  { %1079 = vmatprep.mubr.f32.mxu0 %v404_v51 }
 0x2af   :  { %1080 = vmatmul.mubr.f32.gmra.mrb[18].mxu0 %v1037_v50 }
 0x2b0   :  { %v1040_v52 = vpop.f32.mrb[12].mxu0 }
 0x2b1   :  { %v414_v53 = vpop.f32.mrb[13].mxu0 }
 0x2b2   :  { %1082 = vmatprep.mubr.f32.mxu0 %v414_v53  ;;  %v823_v53 = vld [vmem:[%s1645_s7] ss:$0 sm:$0xff] }
 0x2b3   :  { %1083 = vmatmul.mubr.f32.gmra.mrb[20].mxu0 %v1040_v52 }
 0x2b4   :  { %v1043_v54 = vpop.f32.mrb[14].mxu0 }
 0x2b5   :  { %v424_v55 = vpop.f32.mrb[15].mxu0 }
 0x2b6   :  { %1085 = vmatprep.mubr.f32.mxu0 %v424_v55 }
 0x2b7   :  { %1086 = vmatmul.mubr.f32.gmra.mrb[22].mxu0 %v1043_v54 }
 0x37e   :  { %v1078_v57 = vpop.f32.mrb[16].mxu0 }
 0x37f   :  { %v511_v58 = vadd.f32 %v1078_v57, %v814_v56  ;;  %v505_v59 = vpop.f32.mrb[17].mxu0 }
 0x380   :  { %v506_v60 = vadd.f32 %v814_v56, %v505_v59 }
 0x381   :  { %v545_v61 = vmax.f32 %v511_v58, 0.0 }
 0x382   :  { %v544_v62 = vmax.f32 %v506_v60, 0.0  ;;  %v1081_v63 = vpop.f32.mrb[18].mxu0 }
 0x383   :  { %v521_v0 = vadd.f32 %v1081_v63, %v814_v56  ;;  %v515_v1 = vpop.f32.mrb[19].mxu0 }
 0x384   :  { %v1256_v2 = vpack.c.bf16 %v545_v61, %v544_v62  ;;  %v516_v3 = vadd.f32 %v814_v56, %v515_v1 }
 0x385   :  { %v547_v4 = vmax.f32 %v521_v0, 0.0 }
 0x386   :  { %v546_v5 = vmax.f32 %v516_v3, 0.0  ;;  %v1084_v6 = vpop.f32.mrb[20].mxu0  ;;  %1257 = vmatprep.subr.bf16.mxu1 %v1256_v2 }
 0x387   :  { %v531_v7 = vadd.f32 %v1084_v6, %v814_v56  ;;  %v525_v8 = vpop.f32.mrb[21].mxu0  ;;  %1259 = vmatpush3.bf16.msra.mxu1 %v1256_v2 }
 0x388   :  { %v1260_v9 = vpack.c.bf16 %v547_v4, %v546_v5  ;;  %v526_v10 = vadd.f32 %v814_v56, %v525_v8 }
 0x389   :  { %v549_v11 = vmax.f32 %v531_v7, 0.0 }
 0x38a   :  { %v548_v12 = vmax.f32 %v526_v10, 0.0  ;;  %v1087_v13 = vpop.f32.mrb[22].mxu0  ;;  %1261 = vmatprep.subr.bf16.mxu1 %v1260_v9 }
 0x38b   :  { %v541_v14 = vadd.f32 %v1087_v13, %v814_v56  ;;  %v535_v15 = vpop.f32.mrb[23].mxu0  ;;  %1263 = vmatpush3.bf16.msra.mxu1 %v1260_v9 }
 0x38c   :  { %v1264_v16 = vpack.c.bf16 %v549_v11, %v548_v12  ;;  %v536_v17 = vadd.f32 %v814_v56, %v535_v15 }
 0x38d   :  { %v551_v18 = vmax.f32 %v541_v14, 0.0 }
 0x38e   :  { %v550_v21 = vmax.f32 %v536_v17, 0.0  ;;  %1265 = vmatprep.subr.bf16.mxu1 %v1264_v16 }
 0x38f   :  { %1267 = vmatpush3.bf16.msra.mxu1 %v1264_v16 }
 0x390   :  { %v1268_v22 = vpack.c.bf16 %v551_v18, %v550_v21 }
 0x392   :  { %1269 = vmatprep.subr.bf16.mxu1 %v1268_v22 }
 0x393   :  { %1271 = vmatpush3.bf16.msra.mxu1 %v1268_v22 }
 0x394   :  { %1273 = vmatprep.subr.bf16.mxu1 %v1272_v23 }
 0x396   :  { %1105 = vmatmul.mubr.msk.f32.vlgmr.msra.gmra.mrb[8].mxu1 %vm62_vm0, %v1413_v27  ;;  %v1284_v27 = vpack.c.bf16 %v559_v35, %v558_v34 }
 0x397   :  { %1107 = vmatprep.mubr.msk.f32.mxu1 %vm62_vm0, %v1418_v28  ;;  %1275 = vmatpush3.bf16.msra.mxu1 %v1272_v23  ;;  %v560_v28 = vld [vmem:[%s1644_s6 + $0x40] sm:$0xff] }
 0x398   :  { %1277 = vmatprep.subr.bf16.mxu1 %v1276_v26 }
 0x39a   :  { %1108 = vmatmul.mubr.msk.f32.gmra.mrb[10].mxu1 %vm62_vm0, %v1433_v32  ;;  %v1288_v32 = vpack.c.bf16 %v561_v36, %v560_v28 }
 0x39b   :  { %1110 = vmatprep.mubr.msk.f32.mxu1 %vm62_vm0, %v1438_v33  ;;  %1279 = vmatpush3.bf16.msra.mxu1 %v1276_v26  ;;  %v562_v33 = vld [vmem:[%s1644_s6 + $0x50] sm:$0xff] }
 0x39c   :  { %1281 = vmatprep.subr.bf16.mxu1 %v1280_v31 }
 0x39e   :  { %1111 = vmatmul.mubr.msk.f32.gmra.mrb[12].mxu1 %vm62_vm0, %v1453_v37  ;;  %v1292_v37 = vpack.c.bf16 %v563_v39, %v562_v33 }
 0x39f   :  { %1113 = vmatprep.mubr.msk.f32.mxu1 %vm62_vm0, %v1458_v38  ;;  %1283 = vmatpush3.bf16.msra.mxu1 %v1280_v31  ;;  %v564_v38 = vld [vmem:[%s1644_s6 + $0x60] sm:$0xff] }
 0x3a0   :  { %1285 = vmatprep.subr.bf16.mxu1 %v1284_v27  ;;  %v1296_v41 = vpack.c.bf16 %v565_v40, %v564_v38 }
 0x3a2   :  { %1114 = vmatmul.mubr.msk.f32.gmra.mrb[14].mxu1 %vm62_vm0, %v1473_v42  ;;  %v567_v42 = vld [vmem:[%s1644_s6 + $0x78] sm:$0xff] }
 0x3a3   :  { %1287 = vmatpush3.bf16.msra.mxu1 %v1284_v27  ;;  %v1300_v44 = vpack.c.bf16 %v567_v42, %v566_v43 }
 0x3a4   :  { %1289 = vmatprep.subr.bf16.mxu1 %v1288_v32 }
 0x3a7   :  { %1291 = vmatpush3.bf16.msra.mxu1 %v1288_v32 }
 0x3a8   :  { %1293 = vmatprep.subr.bf16.mxu1 %v1292_v37 }
 0x3ab   :  { %1295 = vmatpush3.bf16.msra.mxu1 %v1292_v37 }
 0x3ac   :  { %1297 = vmatprep.subr.bf16.mxu1 %v1296_v41 }
 0x3af   :  { %1299 = vmatpush3.bf16.msra.mxu1 %v1296_v41 }
 0x3b0   :  { %1301 = vmatprep.subr.bf16.mxu1 %v1300_v44 }
 0x3b3   :  { %1303 = vmatpush3.bf16.msra.mxu1 %v1300_v44 }
 0x469   :  { %v1106_v45 = vpop.f32.mrb[8].mxu1 }
 0x46a   :  { %v635_v46 = vpop.f32.mrb[9].mxu1 }
 0x46b   :  { %1148 = vmatprep.mubr.f32.mxu1 %v635_v46 }
 0x46c   :  { %1149 = vmatmul.mubr.f32.vlgmr.msra.gmra.mrb[16].mxu1 %v1106_v45 }
 0x46d   :  { %v1109_v47 = vpop.f32.mrb[10].mxu1 }
 0x46e   :  { %v645_v48 = vpop.f32.mrb[11].mxu1 }
 0x46f   :  { %1151 = vmatprep.mubr.f32.mxu1 %v645_v48 }
 0x470   :  { %1152 = vmatmul.mubr.f32.gmra.mrb[18].mxu1 %v1109_v47 }
 0x471   :  { %v1112_v49 = vpop.f32.mrb[12].mxu1 }
 0x472   :  { %v655_v50 = vpop.f32.mrb[13].mxu1 }
 0x473   :  { %1154 = vmatprep.mubr.f32.mxu1 %v655_v50 }
 0x474   :  { %1155 = vmatmul.mubr.f32.gmra.mrb[20].mxu1 %v1112_v49 }
 0x475   :  { %v1115_v51 = vpop.f32.mrb[14].mxu1 }
 0x476   :  { %v665_v52 = vpop.f32.mrb[15].mxu1 }
 0x477   :  { %1157 = vmatprep.mubr.f32.mxu1 %v665_v52 }
 0x478   :  { %1158 = vmatmul.mubr.f32.gmra.mrb[22].mxu1 %v1115_v51 }
 0x53f   :  { %v1150_v54 = vpop.f32.mrb[16].mxu1 }
 0x540   :  { %v752_v55 = vadd.f32 %v1150_v54, %v823_v53  ;;  %v746_v56 = vpop.f32.mrb[17].mxu1 }
 0x541   :  { %v747_v57 = vadd.f32 %v823_v53, %v746_v56 }
 0x542   :  { %786 = vst [vmem:[%s1646_s8 + $0x8] sm:$0xff] %v752_v55 }
 0x543   :  { %785 = vst [vmem:[%s1646_s8] sm:$0xff] %v747_v57  ;;  %v1153_v58 = vpop.f32.mrb[18].mxu1 }
 0x544   :  { %v762_v59 = vadd.f32 %v1153_v58, %v823_v53  ;;  %v756_v60 = vpop.f32.mrb[19].mxu1 }
 0x545   :  { %v757_v61 = vadd.f32 %v823_v53, %v756_v60 }
 0x546   :  { %788 = vst [vmem:[%s1646_s8 + $0x18] sm:$0xff] %v762_v59 }
 0x547   :  { %787 = vst [vmem:[%s1646_s8 + $0x10] sm:$0xff] %v757_v61  ;;  %v1156_v62 = vpop.f32.mrb[20].mxu1 }
 0x548   :  { %v772_v63 = vadd.f32 %v1156_v62, %v823_v53  ;;  %v766_v0 = vpop.f32.mrb[21].mxu1 }
 0x549   :  { %v767_v1 = vadd.f32 %v823_v53, %v766_v0 }
 0x54a   :  { %790 = vst [vmem:[%s1646_s8 + $0x28] sm:$0xff] %v772_v63 }
 0x54b   :  { %789 = vst [vmem:[%s1646_s8 + $0x20] sm:$0xff] %v767_v1  ;;  %v1159_v2 = vpop.f32.mrb[22].mxu1 }
 0x54c   :  { %v782_v3 = vadd.f32 %v1159_v2, %v823_v53  ;;  %v776_v4 = vpop.f32.mrb[23].mxu1 }
 0x54d   :  { %v777_v5 = vadd.f32 %v823_v53, %v776_v4 }
 0x54e   :  { %792 = vst [vmem:[%s1646_s8 + $0x38] sm:$0xff] %v782_v3 }
 0x54f   :  { %791 = vst [vmem:[%s1646_s8 + $0x30] sm:$0xff] %v777_v5 }

</bundles_post_ra>
